<compile_context>
chip_gen: v6e
topology: v6e:2x2x1
jax: 0.10.0
libtpu: 0.0.40
codegen_flags: <defaults>
</compile_context>

<pallas_src>
import jax
import jax.numpy as jnp
from jax import lax
from jax.experimental import pallas as pl
from jax.experimental.pallas import tpu as pltpu

EPS = 1e-5

F_IN = 85      # true input features
F_IN_PAD = 128
H1 = 256
H2 = 128
F_OUT = 83     # true output features
F_OUT_PAD = 128


def mlp_kernel(x_ref, w1_ref, w23_ref, gbs_ref, o_ref, xpad_ref):
    inv_b = 1.0 / x_ref.shape[0]   # static batch size

    def bn_relu(h, gamma, beta):
        # Training-mode BatchNorm1d: batch mean / biased batch variance,
        # eps=1e-5, affine (gamma, beta), then ReLU.  One-pass statistics
        # (no reduce->broadcast->reduce chain); variance clamped at 0 to guard
        # against f32 cancellation before rsqrt.
        s = jnp.sum(h, axis=0, keepdims=True)
        s2 = jnp.sum(h * h, axis=0, keepdims=True)
        mean = s * inv_b
        var = jnp.maximum(s2 * inv_b - mean * mean, 0.0)
        scale = gamma * lax.rsqrt(var + EPS)
        return jnp.maximum((h - mean) * scale + beta, 0.0)

    # In-kernel lane pad 85 -> 128: zero the scratch, drop x into [:, :85].
    # (w1p rows 85:128 are also zero, so the pad lanes are doubly safe.)
    xpad_ref[...] = jnp.zeros_like(xpad_ref)
    xpad_ref[:, 0:F_IN] = x_ref[...]
    x_bf = xpad_ref[...].astype(jnp.bfloat16)

    # layer1: Linear(85->256) [bias cancelled by BN] + BN + ReLU
    h1 = jnp.dot(x_bf, w1_ref[...], preferred_element_type=jnp.float32)
    h1 = bn_relu(h1, gbs_ref[0:1, :], gbs_ref[1:2, :])

    # layer2: Linear(256->128) [bias cancelled by BN] + BN + ReLU
    h2 = jnp.dot(h1.astype(jnp.bfloat16), w23_ref[0:H1, :],
                 preferred_element_type=jnp.float32)
    h2 = bn_relu(h2, gbs_ref[2:3, 0:H2], gbs_ref[3:4, 0:H2])

    # decoder: Linear(128->83), output lane-padded to 128 (unmasked store)
    y = jnp.dot(h2.astype(jnp.bfloat16), w23_ref[H1:H1 + H2, :],
                preferred_element_type=jnp.float32)
    o_ref[...] = y + gbs_ref[4:5, 0:F_OUT_PAD]


@jax.jit
def nn_forward(x, kernel_params):
    """x: (B, 85) f32.  kernel_params from pack_params().  Returns (B, 83) f32."""
    w1p, w23, gbs = kernel_params
    B = x.shape[0]

    vmem = pl.BlockSpec(memory_space=pltpu.MemorySpace.VMEM)
    cost = pl.CostEstimate(
        flops=2 * B * (F_IN_PAD * H1 + H1 * H2 + H2 * F_OUT_PAD),
        transcendentals=H1 + H2,  # rsqrt per BN feature
        bytes_accessed=(B * F_IN * 4 + F_IN_PAD * H1 * 2
                        + (H1 + H2) * F_OUT_PAD * 2 + 5 * H1 * 4
                        + B * F_OUT_PAD * 4),
    )

    y_pad = pl.pallas_call(
        mlp_kernel,
        out_shape=jax.ShapeDtypeStruct((B, F_OUT_PAD), jnp.float32),
        in_specs=[vmem] * 4,
        out_specs=vmem,
        scratch_shapes=[pltpu.VMEM((B, F_IN_PAD), jnp.float32)],
        cost_estimate=cost,
    )(x, w1p, w23, gbs)

    # Lane-dense slice; fused by XLA into the consumer.  Callers that accept a
    # (B, 128) padded output can use y_pad directly to skip even this.
    return y_pad[:, :F_OUT]


def init_params(key):
    """PyTorch-layout parameters (f32): weights as (in, out), biases, BN affine."""
    ks = jax.random.split(key, 10)

    def linear(kw, kb, fan_in, fan_out):
        bound = 1.0 / jnp.sqrt(fan_in)
        w = jax.random.uniform(kw, (fan_in, fan_out), jnp.float32, -bound, bound)
        b = jax.random.uniform(kb, (1, fan_out), jnp.float32, -bound, bound)
        return w, b

    w1, b1 = linear(ks[0], ks[1], F_IN, H1)
    w2, b2 = linear(ks[2], ks[3], H1, H2)
    w3, b3 = linear(ks[4], ks[5], H2, F_OUT)

    g1 = 1.0 + 0.1 * jax.random.normal(ks[6], (1, H1), jnp.float32)
    be1 = 0.1 * jax.random.normal(ks[7], (1, H1), jnp.float32)
    g2 = 1.0 + 0.1 * jax.random.normal(ks[8], (1, H2), jnp.float32)
    be2 = 0.1 * jax.random.normal(ks[9], (1, H2), jnp.float32)

    return (w1, b1, g1, be1, w2, b2, g2, be2, w3, b3)


def pack_params(raw):
    """Pack / pad / quantize the PyTorch params into the 3 weight operands."""
    w1, b1, g1, be1, w2, b2, g2, be2, w3, b3 = raw
    del b1, b2  # cancelled by training-mode BatchNorm (see module comment)
    bf = jnp.bfloat16

    # w1 lane-padded on the input (K) side: rows 85:128 zero.
    w1p = jnp.zeros((F_IN_PAD, H1), bf).at[:F_IN, :].set(w1.astype(bf))

    # w2 (256,128) and w3 padded to (128,128) stacked into one (384,128) slab.
    w3p = jnp.zeros((H2, F_OUT_PAD), bf).at[:, :F_OUT].set(w3.astype(bf))
    w23 = jnp.concatenate([w2.astype(bf), w3p], axis=0)            # (384, 128)

    # All small vectors packed into one (5, 256) f32 slab.
    def pad_to_h1(v):
        return jnp.zeros((1, H1), jnp.float32).at[:, :v.shape[1]].set(v)

    b3p = jnp.zeros((1, F_OUT_PAD), jnp.float32).at[:, :F_OUT].set(b3)
    gbs = jnp.concatenate(
        [g1, be1, pad_to_h1(g2), pad_to_h1(be2), pad_to_h1(b3p)], axis=0)

    return (w1p, w23, gbs)


def nn_forward_ref(x, raw):
    """Pure-JAX reference with the original module's structure (b1/b2 kept,
    two-pass variance).  Uses the same bf16 quantization points as the kernel
    so the comparison isolates kernel correctness, not quantization."""
    w1, b1, g1, be1, w2, b2, g2, be2, w3, b3 = raw
    bf = jnp.bfloat16

    def dot_bf16(a, w):
        return jnp.dot(a.astype(bf), w.astype(bf),
                       preferred_element_type=jnp.float32)

    def bn_relu(h, g, b):
        m = jnp.mean(h, axis=0, keepdims=True)
        v = jnp.mean((h - m) ** 2, axis=0, keepdims=True)
        return jnp.maximum((h - m) / jnp.sqrt(v + EPS) * g + b, 0.0)

    h1 = bn_relu(dot_bf16(x, w1) + b1, g1, be1)
    h2 = bn_relu(dot_bf16(h1, w2) + b2, g2, be2)
    return dot_bf16(h2, w3) + b3


if __name__ == "__main__":
    key = jax.random.PRNGKey(0)
    kx, kp = jax.random.split(key)

    B = 16
    x = jax.random.normal(kx, (B, F_IN), jnp.float32)

    raw_params = init_params(kp)
    kernel_params = pack_params(raw_params)

    y = nn_forward(x, kernel_params)
    jax.block_until_ready(y)

    y_ref = nn_forward_ref(x, raw_params)
    assert y.shape == (B, F_OUT), y.shape
    # Tolerance accounts for bf16 MXU operands (kernel and reference share the
    # same quantization points; remaining deltas are accumulation-order level).
    assert jnp.allclose(y, y_ref, atol=5e-3, rtol=5e-3), "mismatch vs reference"

    print("KERNEL_OK")
</pallas_src>

<mosaic_0001>
module attributes {stable_mosaic.version = 11 : i64} {
  func.func @mlp_kernel(%arg0: memref<16x85xf32, #tpu.memory_space<vmem>>, %arg1: memref<128x256xbf16, #tpu.memory_space<vmem>>, %arg2: memref<384x128xbf16, #tpu.memory_space<vmem>>, %arg3: memref<5x256xf32, #tpu.memory_space<vmem>>, %arg4: memref<16x128xf32, #tpu.memory_space<vmem>>, %arg5: memref<16x128xf32, #tpu.memory_space<vmem>>) attributes {dimension_semantics = [], scalar_prefetch = 0 : i64, scratch_operands = 1 : i64, tpu.core_type = #tpu.core_type<tc>} {
    %cst = arith.constant 0.000000e+00 : f32
    %0 = vector.broadcast %cst : f32 to vector<16x128xf32>
    %c0 = arith.constant 0 : index
    %c0_0 = arith.constant 0 : index
    %1 = vector.load %arg5[%c0, %c0_0] : memref<16x128xf32, #tpu.memory_space<vmem>>, vector<16x128xf32>
    tpu.vector_store %arg5[%c0, %c0_0], %0 {strides = array<i32>} : memref<16x128xf32, #tpu.memory_space<vmem>>, vector<16x128xf32>,
    %c0_1 = arith.constant 0 : index
    %c0_2 = arith.constant 0 : index
    %2 = vector.load %arg0[%c0_1, %c0_2] : memref<16x85xf32, #tpu.memory_space<vmem>>, vector<16x85xf32>
    %c0_3 = arith.constant 0 : index
    %c0_4 = arith.constant 0 : index
    %3 = vector.load %arg5[%c0_3, %c0_4] : memref<16x128xf32, #tpu.memory_space<vmem>>, vector<16x85xf32>
    tpu.vector_store %arg5[%c0_3, %c0_4], %2 {strides = array<i32>} : memref<16x128xf32, #tpu.memory_space<vmem>>, vector<16x85xf32>,
    %c0_5 = arith.constant 0 : index
    %c0_6 = arith.constant 0 : index
    %4 = vector.load %arg5[%c0_5, %c0_6] : memref<16x128xf32, #tpu.memory_space<vmem>>, vector<16x128xf32>
    %5 = arith.truncf %4 : vector<16x128xf32> to vector<16x128xbf16>
    %c0_7 = arith.constant 0 : index
    %c0_8 = arith.constant 0 : index
    %6 = vector.load %arg1[%c0_7, %c0_8] : memref<128x256xbf16, #tpu.memory_space<vmem>>, vector<128x256xbf16>
    %cst_9 = arith.constant dense<0.000000e+00> : vector<16x256xf32>
    %7 = tpu.matmul %5, %6, %cst_9 {dimension_numbers = #tpu.dot_dimension_numbers<[1], [0], [0], [1], [0, 0, 1, 1], [], []>} : vector<16x128xbf16>, vector<128x256xbf16>, vector<16x256xf32> -> vector<16x256xf32>
    %c0_10 = arith.constant 0 : index
    %c0_11 = arith.constant 0 : index
    %8 = vector.load %arg3[%c0_10, %c0_11] : memref<5x256xf32, #tpu.memory_space<vmem>>, vector<1x256xf32>
    %c1 = arith.constant 1 : index
    %c0_12 = arith.constant 0 : index
    %9 = vector.load %arg3[%c1, %c0_12] : memref<5x256xf32, #tpu.memory_space<vmem>>, vector<1x256xf32>
    %cst_13 = arith.constant dense<0.000000e+00> : vector<256xf32>
    %10 = vector.multi_reduction <add>, %7, %cst_13 [0] : vector<16x256xf32> to vector<256xf32>
    %11 = vector.shape_cast %10 : vector<256xf32> to vector<1x256xf32>
    %12 = arith.mulf %7, %7 : vector<16x256xf32>
    %cst_14 = arith.constant dense<0.000000e+00> : vector<256xf32>
    %13 = vector.multi_reduction <add>, %12, %cst_14 [0] : vector<16x256xf32> to vector<256xf32>
    %14 = vector.shape_cast %13 : vector<256xf32> to vector<1x256xf32>
    %cst_15 = arith.constant 6.250000e-02 : f32
    %15 = vector.broadcast %cst_15 : f32 to vector<1x256xf32>
    %16 = arith.mulf %11, %15 : vector<1x256xf32>
    %cst_16 = arith.constant 6.250000e-02 : f32
    %17 = vector.broadcast %cst_16 : f32 to vector<1x256xf32>
    %18 = arith.mulf %14, %17 : vector<1x256xf32>
    %19 = arith.mulf %16, %16 : vector<1x256xf32>
    %20 = arith.subf %18, %19 : vector<1x256xf32>
    %cst_17 = arith.constant 0.000000e+00 : f32
    %21 = vector.broadcast %cst_17 : f32 to vector<1x256xf32>
    %22 = arith.maximumf %20, %21 : vector<1x256xf32>
    %cst_18 = arith.constant 9.99999974E-6 : f32
    %23 = vector.broadcast %cst_18 : f32 to vector<1x256xf32>
    %24 = arith.addf %22, %23 : vector<1x256xf32>
    %25 = math.rsqrt %24 : vector<1x256xf32>
    %26 = arith.mulf %8, %25 : vector<1x256xf32>
    %27 = vector.broadcast %16 : vector<1x256xf32> to vector<16x256xf32>
    %28 = arith.subf %7, %27 : vector<16x256xf32>
    %29 = vector.broadcast %26 : vector<1x256xf32> to vector<16x256xf32>
    %30 = arith.mulf %28, %29 : vector<16x256xf32>
    %31 = vector.broadcast %9 : vector<1x256xf32> to vector<16x256xf32>
    %32 = arith.addf %30, %31 : vector<16x256xf32>
    %cst_19 = arith.constant 0.000000e+00 : f32
    %33 = vector.broadcast %cst_19 : f32 to vector<16x256xf32>
    %34 = arith.maximumf %32, %33 : vector<16x256xf32>
    %35 = arith.truncf %34 : vector<16x256xf32> to vector<16x256xbf16>
    %c0_20 = arith.constant 0 : index
    %c0_21 = arith.constant 0 : index
    %36 = vector.load %arg2[%c0_20, %c0_21] : memref<384x128xbf16, #tpu.memory_space<vmem>>, vector<256x128xbf16>
    %cst_22 = arith.constant dense<0.000000e+00> : vector<16x128xf32>
    %37 = tpu.matmul %35, %36, %cst_22 {dimension_numbers = #tpu.dot_dimension_numbers<[1], [0], [0], [1], [0, 0, 1, 1], [], []>} : vector<16x256xbf16>, vector<256x128xbf16>, vector<16x128xf32> -> vector<16x128xf32>
    %c2 = arith.constant 2 : index
    %c0_23 = arith.constant 0 : index
    %38 = vector.load %arg3[%c2, %c0_23] : memref<5x256xf32, #tpu.memory_space<vmem>>, vector<1x128xf32>
    %c3 = arith.constant 3 : index
    %c0_24 = arith.constant 0 : index
    %39 = vector.load %arg3[%c3, %c0_24] : memref<5x256xf32, #tpu.memory_space<vmem>>, vector<1x128xf32>
    %cst_25 = arith.constant dense<0.000000e+00> : vector<128xf32>
    %40 = vector.multi_reduction <add>, %37, %cst_25 [0] : vector<16x128xf32> to vector<128xf32>
    %41 = vector.shape_cast %40 : vector<128xf32> to vector<1x128xf32>
    %42 = arith.mulf %37, %37 : vector<16x128xf32>
    %cst_26 = arith.constant dense<0.000000e+00> : vector<128xf32>
    %43 = vector.multi_reduction <add>, %42, %cst_26 [0] : vector<16x128xf32> to vector<128xf32>
    %44 = vector.shape_cast %43 : vector<128xf32> to vector<1x128xf32>
    %cst_27 = arith.constant 6.250000e-02 : f32
    %45 = vector.broadcast %cst_27 : f32 to vector<1x128xf32>
    %46 = arith.mulf %41, %45 : vector<1x128xf32>
    %cst_28 = arith.constant 6.250000e-02 : f32
    %47 = vector.broadcast %cst_28 : f32 to vector<1x128xf32>
    %48 = arith.mulf %44, %47 : vector<1x128xf32>
    %49 = arith.mulf %46, %46 : vector<1x128xf32>
    %50 = arith.subf %48, %49 : vector<1x128xf32>
    %cst_29 = arith.constant 0.000000e+00 : f32
    %51 = vector.broadcast %cst_29 : f32 to vector<1x128xf32>
    %52 = arith.maximumf %50, %51 : vector<1x128xf32>
    %cst_30 = arith.constant 9.99999974E-6 : f32
    %53 = vector.broadcast %cst_30 : f32 to vector<1x128xf32>
    %54 = arith.addf %52, %53 : vector<1x128xf32>
    %55 = math.rsqrt %54 : vector<1x128xf32>
    %56 = arith.mulf %38, %55 : vector<1x128xf32>
    %57 = vector.broadcast %46 : vector<1x128xf32> to vector<16x128xf32>
    %58 = arith.subf %37, %57 : vector<16x128xf32>
    %59 = vector.broadcast %56 : vector<1x128xf32> to vector<16x128xf32>
    %60 = arith.mulf %58, %59 : vector<16x128xf32>
    %61 = vector.broadcast %39 : vector<1x128xf32> to vector<16x128xf32>
    %62 = arith.addf %60, %61 : vector<16x128xf32>
    %cst_31 = arith.constant 0.000000e+00 : f32
    %63 = vector.broadcast %cst_31 : f32 to vector<16x128xf32>
    %64 = arith.maximumf %62, %63 : vector<16x128xf32>
    %65 = arith.truncf %64 : vector<16x128xf32> to vector<16x128xbf16>
    %c256 = arith.constant 256 : index
    %c0_32 = arith.constant 0 : index
    %66 = vector.load %arg2[%c256, %c0_32] : memref<384x128xbf16, #tpu.memory_space<vmem>>, vector<128x128xbf16>
    %cst_33 = arith.constant dense<0.000000e+00> : vector<16x128xf32>
    %67 = tpu.matmul %65, %66, %cst_33 {dimension_numbers = #tpu.dot_dimension_numbers<[1], [0], [0], [1], [0, 0, 1, 1], [], []>} : vector<16x128xbf16>, vector<128x128xbf16>, vector<16x128xf32> -> vector<16x128xf32>
    %c4 = arith.constant 4 : index
    %c0_34 = arith.constant 0 : index
    %68 = vector.load %arg3[%c4, %c0_34] : memref<5x256xf32, #tpu.memory_space<vmem>>, vector<1x128xf32>
    %69 = vector.broadcast %68 : vector<1x128xf32> to vector<16x128xf32>
    %70 = arith.addf %67, %69 : vector<16x128xf32>
    %c0_35 = arith.constant 0 : index
    %c0_36 = arith.constant 0 : index
    %71 = vector.load %arg4[%c0_35, %c0_36] : memref<16x128xf32, #tpu.memory_space<vmem>>, vector<16x128xf32>
    tpu.vector_store %arg4[%c0_35, %c0_36], %70 {strides = array<i32>} : memref<16x128xf32, #tpu.memory_space<vmem>>, vector<16x128xf32>,
    return
  }
}

</mosaic_0001>

<bundles_post_ra>
// kernel: nn_forward.1
= control target key start
LH: loop header
LB: loop body
LE: loop exit
PB: predicated region body
PF: predicated region fallthrough
CT: control target
= control target key end

     0   :  { %9 = vsyncpa [#allocation4], 0  ;;  %s1023_s0 = inlined_call_operand.hbm [shape: f32[16,85], index: 0, kind: input, shape index: {}]   ;;  %s1024_s1 = inlined_call_operand.hbm [shape: bf16[128,256], index: 1, kind: input, shape index: {}]   ;;  %s1025_s2 = inlined_call_operand.hbm [shape: bf16[384,128], index: 2, kind: input, shape index: {}]   ;;  %s1026_s3 = inlined_call_operand.hbm [shape: f32[5,256], index: 3, kind: input, shape index: {}]   ;;  %s1027_s4 = inlined_call_operand.hbm [shape: f32[16,128], index: 4, kind: output, shape index: {}]  }
   0x1   :  { %10 = vsyncpa [#allocation7], 0 }
   0x2   :  { %11 = vsyncpa [#allocation10], 0 }
   0x3   :  { %12 = vsyncpa [#allocation5], 0  ;;  %s926_s15 = smov [#allocation6]   ;;  %s927_s17 = smov [#allocation3]  }
   0x4   :  { %s30_s16 = sshll.u32 %s926_s15, 4  ;;  %s18_s18 = sshll.u32 %s927_s17, 4  ;;  %s31_s16 = int_to_ptr.vmem [resolvable:$true] %s30_s16  ;;  %s19_s18 = int_to_ptr.vmem [resolvable:$true] %s18_s18 }
   0x5   :  { %s826_s19 = scalar_lea.vmem %s31_s16, 2048  ;;  %p831_p1 = scmp.lt.s32.totalorder %s31_s16, %s31_s16 }
   0x6   :  { %p827_p0 = scmp.ne.s32.totalorder %s31_s16, %s826_s19  ;;  %p832_p2 = scmp.lt.s32.totalorder %s826_s19, %s826_s19 }
   0x8   :  { %p833_p3 = por %p832_p2, %p831_p1 }
   0xa   :  { %p834_p4 = pnand %p833_p3, %p827_p0 }
   0xc   :  { %837 = shalt.err (!%p834_p4)
}
   0xd   :  { %s928_s20 = smov 128   ;;  %s929_s21 = smov 8  }
   0xe   :  { %36 = dma.hbm_to_vmem [thread:$0]  %s1024_s1, 2048, %s31_s16, [#allocation7], %s928_s20, %s928_s20, %s929_s21  }
   0xf   :  { %s846_s24 = scalar_lea.vmem %s19_s18, 256  ;;  %p851_p6 = scmp.lt.s32.totalorder %s19_s18, %s19_s18 }
  0x10   :  { %p847_p5 = scmp.ne.s32.totalorder %s19_s18, %s846_s24  ;;  %p852_p7 = scmp.lt.s32.totalorder %s846_s24, %s846_s24 }
  0x12   :  { %p853_p8 = por %p852_p7, %p851_p6 }
  0x14   :  { %p854_p9 = pnand %p853_p8, %p847_p5 }
  0x16   :  { %857 = shalt.err (!%p854_p9)
}
  0x17   :  { %24 = dma.hbm_to_vmem [thread:$0]  %s1023_s0, 256, %s19_s18, [#allocation4], %s928_s20, %s928_s20, %s929_s21  }
  0x18   :  { %s930_s27 = smov [#allocation8]  }
  0x19   :  { %s42_s28 = sshll.u32 %s930_s27, 4  ;;  %s43_s28 = int_to_ptr.vmem [resolvable:$true] %s42_s28 }
  0x1a   :  { %s866_s29 = scalar_lea.vmem %s43_s28, 3072  ;;  %p871_p11 = scmp.lt.s32.totalorder %s43_s28, %s43_s28 }
  0x1b   :  { %p867_p10 = scmp.ne.s32.totalorder %s43_s28, %s866_s29  ;;  %p872_p12 = scmp.lt.s32.totalorder %s866_s29, %s866_s29 }
  0x1d   :  { %p873_p13 = por %p872_p12, %p871_p11 }
  0x1f   :  { %p874_p0 = pnand %p873_p13, %p867_p10 }
  0x21   :  { %877 = shalt.err (!%p874_p0)
}
  0x22   :  { %s931_s1 = smov 64   ;;  %s932_s30 = smov 4  }
  0x23   :  { %48 = dma.hbm_to_vmem [thread:$0]  %s1025_s2, 3072, %s43_s28, [#allocation7], %s931_s1, %s931_s1, %s932_s30  }
  0x24   :  { %s933_s7 = smov [#allocation9]  }
  0x25   :  { %s55_s8 = sshll.u32 %s933_s7, 4  ;;  %s56_s8 = int_to_ptr.vmem [resolvable:$true] %s55_s8 }
  0x26   :  { %s886_s0 = scalar_lea.vmem %s56_s8, 256  ;;  %p891_p2 = scmp.lt.s32.totalorder %s56_s8, %s56_s8 }
  0x27   :  { %p887_p1 = scmp.ne.s32.totalorder %s56_s8, %s886_s0  ;;  %p892_p3 = scmp.lt.s32.totalorder %s886_s0, %s886_s0 }
  0x29   :  { %p893_p4 = por %p892_p3, %p891_p2 }
  0x2b   :  { %p894_p5 = pnand %p893_p4, %p887_p1 }
  0x2d   :  { %897 = shalt.err (!%p894_p5)
}
  0x2e   :  { %58 = dma.hbm_to_vmem [thread:$0]  %s1026_s3, 256, %s56_s8, [#allocation10]  }
  0x2f   :  { %918 = dma.done.wait [#allocation4], 256  }
  0x30   :  { %919 = vsyncadd [#allocation4], 4294967040 }
  0x31   :  { %920 = dma.done.wait [#allocation7], 5120  }
  0x32   :  { %921 = vsyncadd [#allocation7], 4294962176 }
  0x33   :  { %922 = dma.done.wait [#allocation10], 256  }
  0x34   :  { %923 = vsyncadd [#allocation10], 4294967040  ;;  %v934_v0 = vmov 0   ;;  %v935_v1 = vmov 0.0   ;;  %v764_v2 = vld [vmem:[#allocation6 + $0x74] ss:$8 sps:$4 sm:$0xff]  }
  0x35   :  { %210 = vmatprep.mubr.bf16.mxu0 %v934_v0  ;;  %72 = vst [vmem:[#allocation2] sm:$0xff] %v935_v1  ;;  %73 = vst [vmem:[#allocation2 + $0x8] sm:$0xff] %v935_v1  ;;  %v766_v3 = vld [vmem:[#allocation6 + $0x70] ss:$8 sps:$4 sm:$0xff]   ;;  %178 = vmatprep.subr.bf16.mxu0 %v764_v2  ;;  %v767_v4 = vld [vmem:[#allocation6 + $0x64] ss:$8 sps:$4 sm:$0xff]  }
  0x36   :  { %179 = vmatpush1.bf16.msra.mxu0 %v766_v3  ;;  %v769_v5 = vld [vmem:[#allocation6 + $0x60] ss:$8 sps:$4 sm:$0xff]   ;;  %v770_v6 = vld [vmem:[#allocation6 + $0x54] ss:$8 sps:$4 sm:$0xff]   ;;  %v772_v7 = vld [vmem:[#allocation6 + $0x50] ss:$8 sps:$4 sm:$0xff]  }
  0x37   :  { %180 = vmatprep.subr.bf16.mxu0 %v767_v4  ;;  %v773_v8 = vld [vmem:[#allocation6 + $0x44] ss:$8 sps:$4 sm:$0xff]   ;;  %vm76_vm0 = vcmask 695296   ;;  %v775_v9 = vld [vmem:[#allocation6 + $0x40] ss:$8 sps:$4 sm:$0xff]   ;;  %v74_v11 = vld [vmem:[#allocation3] sm:$0xff] }
  0x38   :  { %v776_v10 = vld [vmem:[#allocation6 + $0x34] ss:$8 sps:$4 sm:$0xff]   ;;  %77 = vst.msk [vmem:[#allocation2] sm:$0xff] %vm76_vm0, %v74_v11  ;;  %v778_v13 = vld [vmem:[#allocation6 + $0x30] ss:$8 sps:$4 sm:$0xff]   ;;  %v792_v27 = vld [vmem:[#allocation8 + $0x68] sm:$0xff]  }
  0x39   :  { %v75_v12 = vld [vmem:[#allocation3 + $0x8] sm:$0xff]  ;;  %v779_v14 = vld [vmem:[#allocation6 + $0x24] ss:$8 sps:$4 sm:$0xff]   ;;  %v781_v15 = vld [vmem:[#allocation6 + $0x20] ss:$8 sps:$4 sm:$0xff]   ;;  %vm937_vm1 = vmmov 0  }
  0x3a   :  { %181 = vmatpush1.bf16.msra.mxu0 %v769_v5  ;;  %78 = vst.msk [vmem:[#allocation2 + $0x8] sm:$0xff] %vm76_vm0, %v75_v12  ;;  %v782_v16 = vld [vmem:[#allocation6 + $0x14] ss:$8 sps:$4 sm:$0xff]   ;;  %v784_v17 = vld [vmem:[#allocation6 + $0x10] ss:$8 sps:$4 sm:$0xff]   ;;  %v793_v28 = vld [vmem:[#allocation8 + $0x28] sm:$0xff]  }
  0x3b   :  { %182 = vmatprep.subr.bf16.mxu0 %v770_v6  ;;  %v785_v18 = vld [vmem:[#allocation6 + $0x4] ss:$8 sps:$4 sm:$0xff]   ;;  %v787_v19 = vld [vmem:[#allocation6] ss:$8 sps:$4 sm:$0xff]   ;;  %v788_v23 = vld [vmem:[#allocation8 + $0x78] sm:$0xff]   ;;  %s938_s2 = smov [#allocation11]  }
  0x3c   :  { %v789_v24 = vld [vmem:[#allocation8 + $0x38] sm:$0xff]   ;;  %v790_v25 = vld [vmem:[#allocation8 + $0x70] sm:$0xff]   ;;  %700 = vmatprep.subr.bf16.mxu1 %v788_v23  ;;  %v794_v29 = vld [vmem:[#allocation8 + $0x60] sm:$0xff]   ;;  %s646_s3 = sshll.u32 %s938_s2, 4  ;;  %s647_s3 = int_to_ptr.vmem [resolvable:$true] %s646_s3 }
  0x3d   :  { %701 = vmatpush3.bf16.msra.mxu1 %v789_v24  ;;  %v791_v26 = vld [vmem:[#allocation8 + $0x30] sm:$0xff]   ;;  %v795_v30 = vld [vmem:[#allocation8 + $0x20] sm:$0xff]   ;;  %v796_v31 = vld [vmem:[#allocation8 + $0x58] sm:$0xff]   ;;  %v936_v24 = vmov 1966171168   ;;  %s898_s11 = scalar_lea.vmem %s647_s3, 256  ;;  %p903_p7 = scmp.lt.s32.totalorder %s647_s3, %s647_s3 }
  0x3e   :  { %183 = vmatpush1.bf16.msra.mxu0 %v772_v7  ;;  %702 = vmatprep.subr.bf16.mxu1 %v790_v25  ;;  %v797_v32 = vld [vmem:[#allocation8 + $0x18] sm:$0xff]   ;;  %v798_v33 = vld [vmem:[#allocation8 + $0x50] sm:$0xff]   ;;  %v800_v35 = vld [vmem:[#allocation8 + $0x48] sm:$0xff]   ;;  %v274_v25 = vunpack.c.l.s4 %v936_v24  ;;  %p899_p6 = scmp.ne.s32.totalorder %s647_s3, %s898_s11  ;;  %p904_p8 = scmp.lt.s32.totalorder %s898_s11, %s898_s11 }
  0x3f   :  { %184 = vmatprep.subr.bf16.mxu0 %v773_v8  ;;  %v79_v20 = vld [vmem:[#allocation2] sm:$0xff]  ;;  %v799_v34 = vld [vmem:[#allocation8 + $0x10] sm:$0xff]   ;;  %v801_v36 = vld [vmem:[#allocation8 + $0x8] sm:$0xff]  }
  0x40   :  { %v802_v37 = vld [vmem:[#allocation8 + $0x40] sm:$0xff]   ;;  %p905_p9 = por %p904_p8, %p903_p7 }
  0x41   :  { %v80_v21 = vld [vmem:[#allocation2 + $0x8] sm:$0xff]  ;;  %703 = vmatpush3.bf16.msra.mxu1 %v791_v26  ;;  %v803_v38 = vld [vmem:[#allocation8] sm:$0xff]   ;;  %v276_v26 = vlaneseq }
  0x42   :  { %185 = vmatpush1.bf16.msra.mxu0 %v775_v9  ;;  %v81_v22 = vpack.c.bf16 %v80_v21, %v79_v20  ;;  %704 = vmatprep.subr.bf16.mxu1 %v792_v27  ;;  %v275_v27 = vunpack.c.0.s8 %v274_v25  ;;  %p906_p10 = pnand %p905_p9, %p899_p6 }
  0x43   :  { %186 = vmatprep.subr.bf16.mxu0 %v776_v10 }
  0x45   :  { %705 = vmatpush3.bf16.msra.mxu1 %v793_v28  ;;  %v277_v28 = vshrl.u32 %v276_v26, 7 }
  0x46   :  { %187 = vmatpush1.bf16.msra.mxu0 %v778_v13  ;;  %706 = vmatprep.subr.bf16.mxu1 %v794_v29 }
  0x47   :  { %188 = vmatprep.subr.bf16.mxu0 %v779_v14 }
  0x49   :  { %707 = vmatpush3.bf16.msra.mxu1 %v795_v30  ;;  %v278_v30 = vsub.s32 %v275_v27, %v277_v28 }
  0x4a   :  { %189 = vmatpush1.bf16.msra.mxu0 %v781_v15  ;;  %708 = vmatprep.subr.bf16.mxu1 %v796_v31 }
  0x4b   :  { %190 = vmatprep.subr.bf16.mxu0 %v782_v16 }
  0x4d   :  { %709 = vmatpush3.bf16.msra.mxu1 %v797_v32 }
  0x4e   :  { %191 = vmatpush1.bf16.msra.mxu0 %v784_v17  ;;  %710 = vmatprep.subr.bf16.mxu1 %v798_v33 }
  0x4f   :  { %192 = vmatprep.subr.bf16.mxu0 %v785_v18 }
  0x51   :  { %711 = vmatpush3.bf16.msra.mxu1 %v799_v34  ;;  %v221_v34 = vld [vmem:[#allocation9] ss:$8 sm:$0x3] }
  0x52   :  { %193 = vmatpush1.bf16.msra.mxu0 %v787_v19  ;;  %712 = vmatprep.subr.bf16.mxu1 %v800_v35  ;;  %v223_v35 = vld [vmem:[#allocation9 + $0x1] ss:$8 sm:$0x3] }
  0x53   :  { %731 = vmatprep.subr.bf16.mxu0 %v935_v1 }
  0x55   :  { %211 = vmatmul.mubr.bf16.vlgmr.msra.gmra.mxu0 %v81_v22  ;;  %713 = vmatpush3.bf16.msra.mxu1 %v801_v36 }
  0x56   :  { %714 = vmatprep.subr.bf16.mxu1 %v802_v37  ;;  %v296_v37 = vsub.s32 0, %v277_v28  ;;  %747 = vmatprep.mubr.msk.bf16.mxu0 %vm937_vm1, %v935_v1 }
  0x59   :  { %715 = vmatpush3.bf16.msra.mxu1 %v803_v38  ;;  %v300_v38 = vsub.s32 1, %v277_v28 }
 0x115   :  { %v985_v39 = vpop.f32.mrf.mxu0 }
 0x116   :  { %v238_v42 = vmul.f32 %v985_v39, %v985_v39 }
 0x117   :  { %v987_v40 = vpop.f32.mrf.mxu0 }
 0x118   :  { %v239_v45 = vmul.f32 %v987_v40, %v987_v40 }
 0x119   :  { %v989_v41 = vpop.f32.mrf.mxu0 }
 0x11a   :  { %v224_v43 = vadd.f32 %v989_v41, %v985_v39  ;;  %v240_v44 = vmul.f32 %v989_v41, %v989_v41 }
 0x11b   :  { %v999_v46 = vpop.f32.mrf.mxu0 }
 0x11c   :  { %v225_v47 = vrot.slane %v224_v43, 4  ;;  %v242_v48 = vadd.f32 %v240_v44, %v238_v42  ;;  %v231_v49 = vadd.f32 %v999_v46, %v987_v40  ;;  %v241_v50 = vmul.f32 %v999_v46, %v999_v46 }
 0x11d   :  { %v312_v44 = vrot.slane %v223_v35, %v296_v37 }
 0x11e   :  { %v226_v51 = vadd.f32 %v225_v47, %v224_v43  ;;  %v243_v52 = vrot.slane %v242_v48, 4  ;;  %v232_v53 = vrot.slane %v231_v49, 4  ;;  %v249_v54 = vadd.f32 %v241_v50, %v239_v45 }
 0x11f   :  { %v316_v45 = vrot.slane %v223_v35, %v300_v38 }
 0x120   :  { %v227_v55 = vrot.slane %v226_v51, 2  ;;  %v244_v56 = vadd.f32 %v243_v52, %v242_v48  ;;  %v233_v57 = vadd.f32 %v232_v53, %v231_v49  ;;  %v250_v58 = vrot.slane %v249_v54, 4 }
 0x122   :  { %v228_v59 = vadd.f32 %v227_v55, %v226_v51  ;;  %v245_v60 = vrot.slane %v244_v56, 2  ;;  %v234_v61 = vrot.slane %v233_v57, 2  ;;  %v251_v62 = vadd.f32 %v250_v58, %v249_v54 }
 0x124   :  { %v229_v63 = vrot.slane %v228_v59, 1  ;;  %v246_v0 = vadd.f32 %v245_v60, %v244_v56  ;;  %v235_v2 = vadd.f32 %v234_v61, %v233_v57  ;;  %v252_v3 = vrot.slane %v251_v62, 2 }
 0x126   :  { %v230_v4 = vadd.f32 %v229_v63, %v228_v59  ;;  %v247_v5 = vrot.slane %v246_v0, 1  ;;  %v236_v6 = vrot.slane %v235_v2, 1  ;;  %v253_v7 = vadd.f32 %v252_v3, %v251_v62  ;;  %v808_v3 = vld [vmem:[#allocation8 + $0x98] sm:$0xff]  }
 0x128   :  { %v248_v8 = vadd.f32 %v247_v5, %v246_v0  ;;  %v256_v9 = vmul.f32 0.0625, %v230_v4  ;;  %v237_v10 = vadd.f32 %v236_v6, %v235_v2  ;;  %v254_v11 = vrot.slane %v253_v7, 1  ;;  %v806_v0 = vld [vmem:[#allocation8 + $0xa8] sm:$0xff]   ;;  %v807_v2 = vld [vmem:[#allocation8 + $0xa0] sm:$0xff]   ;;  %v809_v4 = vld [vmem:[#allocation8 + $0x90] sm:$0xff]  }
 0x129   :  { %v810_v5 = vld [vmem:[#allocation8 + $0x88] sm:$0xff]   ;;  %v811_v6 = vld [vmem:[#allocation8 + $0x80] sm:$0xff]  }
 0x12a   :  { %v258_v12 = vmul.f32 0.0625, %v248_v8  ;;  %v260_v13 = vmul.f32 %v256_v9, %v256_v9  ;;  %v255_v14 = vadd.f32 %v254_v11, %v253_v7  ;;  %v257_v15 = vmul.f32 0.0625, %v237_v10 }
 0x12b   :  { %v291_v43 = vsub.f32 %v989_v41, %v256_v9  ;;  %v289_v47 = vsub.f32 %v985_v39, %v256_v9 }
 0x12c   :  { %v262_v16 = vsub.f32 %v258_v12, %v260_v13  ;;  %v259_v17 = vmul.f32 0.0625, %v255_v14  ;;  %v261_v18 = vmul.f32 %v257_v15, %v257_v15  ;;  %v292_v48 = vsub.f32 %v999_v46, %v257_v15  ;;  %v804_v46 = vld [vmem:[#allocation8 + $0xb8] sm:$0xff]  }
 0x12d   :  { %v290_v49 = vsub.f32 %v987_v40, %v257_v15  ;;  %732 = vmatpush3.bf16.msra.mxu0 %v804_v46  ;;  %v805_v40 = vld [vmem:[#allocation8 + $0xb0] sm:$0xff]  }
 0x12e   :  { %v264_v19 = vmax.f32 %v262_v16, 0.0  ;;  %v263_v20 = vsub.f32 %v259_v17, %v261_v18  ;;  %733 = vmatprep.subr.bf16.mxu0 %v935_v1 }
 0x130   :  { %v266_v21 = vadd.f32 1e-05, %v264_v19  ;;  %v265_v22 = vmax.f32 %v263_v20, 0.0 }
 0x131   :  { %734 = vmatpush3.bf16.msra.mxu0 %v805_v40 }
 0x132   :  { %v267_v23 = vadd.f32 1e-05, %v265_v22  ;;  %812 = vrsqrt.f32 %v266_v21  ;;  %735 = vmatprep.subr.bf16.mxu0 %v935_v1 }
 0x134   :  { %814 = vrsqrt.f32 %v267_v23 }
 0x135   :  { %736 = vmatpush3.bf16.msra.mxu0 %v806_v0 }
 0x136   :  { %737 = vmatprep.subr.bf16.mxu0 %v935_v1 }
 0x139   :  { %738 = vmatpush3.bf16.msra.mxu0 %v807_v2 }
 0x13a   :  { %739 = vmatprep.subr.bf16.mxu0 %v935_v1 }
 0x13d   :  { %740 = vmatpush3.bf16.msra.mxu0 %v808_v3 }
 0x13e   :  { %741 = vmatprep.subr.bf16.mxu0 %v935_v1 }
 0x13f   :  { %v813_v29 = vpop.eup %812 }
 0x141   :  { %v815_v31 = vpop.eup %814  ;;  %742 = vmatpush3.bf16.msra.mxu0 %v809_v4 }
 0x142   :  { %v272_v32 = vcombine.low %v813_v29, %v815_v31  ;;  %743 = vmatprep.subr.bf16.mxu0 %v935_v1 }
 0x144   :  { %v279_v33 = vrot.slane %v272_v32, %v278_v30 }
 0x145   :  { %744 = vmatpush3.bf16.msra.mxu0 %v810_v5 }
 0x146   :  { %v286_v36 = vrot.slane %v279_v33, %v278_v30  ;;  %745 = vmatprep.subr.bf16.mxu0 %v935_v1 }
 0x148   :  { %v288_v42 = vmul.f32 %v286_v36, %v221_v34  ;;  %v498_v34 = vld [vmem:[#allocation9 + $0x2] ss:$0 sm:$0xff] }
 0x149   :  { %746 = vmatpush3.bf16.msra.mxu0 %v811_v6 }
 0x14a   :  { %v301_v50 = vrot.slane %v288_v42, %v300_v38  ;;  %v297_v51 = vrot.slane %v288_v42, %v296_v37  ;;  %v499_v42 = vld [vmem:[#allocation9 + $0x3] ss:$0 sm:$0xff] }
 0x14c   :  { %v305_v52 = vmul.f32 %v301_v50, %v290_v49  ;;  %v307_v53 = vmul.f32 %v301_v50, %v292_v48  ;;  %v304_v54 = vmul.f32 %v297_v51, %v289_v47  ;;  %v306_v55 = vmul.f32 %v297_v51, %v291_v43  ;;  %v549_v51 = vld [vmem:[#allocation9 + $0x4] ss:$0 sm:$0xff] }
 0x14e   :  { %v320_v56 = vadd.f32 %v316_v45, %v305_v52  ;;  %v322_v57 = vadd.f32 %v316_v45, %v307_v53  ;;  %v319_v58 = vadd.f32 %v312_v44, %v304_v54  ;;  %v321_v59 = vadd.f32 %v312_v44, %v306_v55 }
 0x150   :  { %v324_v60 = vmax.f32 %v320_v56, 0.0  ;;  %v326_v41 = vmax.f32 %v322_v57, 0.0  ;;  %v323_v61 = vmax.f32 %v319_v58, 0.0  ;;  %v325_v62 = vmax.f32 %v321_v59, 0.0 }
 0x152   :  { %v328_v63 = vpack.c.bf16 %v326_v41, %v324_v60  ;;  %v327_v39 = vpack.c.bf16 %v325_v62, %v323_v61 }
 0x154   :  { %489 = vmatprep.mubr.bf16.mxu1 %v328_v63 }
 0x155   :  { %490 = vmatmul.mubr.bf16.vlgmr.msra.gmra.mxu1 %v327_v39 }
 0x215   :  { %v716_v7 = vpop.f32.mrf.mxu1 }
 0x217   :  { %v717_v8 = vpop.f32.mrf.mxu1 }
 0x218   :  { %v718_v10 = vadd.f32 %v717_v8, %v716_v7 }
 0x219   :  { %v719_v9 = vpop.f32.mrf.mxu1 }
 0x21a   :  { %v507_v13 = vmul.f32 %v718_v10, %v718_v10 }
 0x21b   :  { %v720_v11 = vpop.f32.mrf.mxu1 }
 0x21c   :  { %v721_v12 = vadd.f32 %v720_v11, %v719_v9 }
 0x21e   :  { %v500_v14 = vadd.f32 %v721_v12, %v718_v10  ;;  %v508_v15 = vmul.f32 %v721_v12, %v721_v12 }
 0x220   :  { %v501_v16 = vrot.slane %v500_v14, 4  ;;  %v509_v17 = vadd.f32 %v508_v15, %v507_v13 }
 0x222   :  { %v502_v18 = vadd.f32 %v501_v16, %v500_v14  ;;  %v510_v19 = vrot.slane %v509_v17, 4 }
 0x224   :  { %v503_v20 = vrot.slane %v502_v18, 2  ;;  %v511_v21 = vadd.f32 %v510_v19, %v509_v17 }
 0x226   :  { %v504_v22 = vadd.f32 %v503_v20, %v502_v18  ;;  %v512_v23 = vrot.slane %v511_v21, 2 }
 0x228   :  { %v505_v24 = vrot.slane %v504_v22, 1  ;;  %v513_v1 = vadd.f32 %v512_v23, %v511_v21 }
 0x22a   :  { %v506_v25 = vadd.f32 %v505_v24, %v504_v22  ;;  %v514_v26 = vrot.slane %v513_v1, 1 }
 0x22c   :  { %v515_v27 = vadd.f32 %v514_v26, %v513_v1  ;;  %v516_v28 = vmul.f32 0.0625, %v506_v25 }
 0x22e   :  { %v517_v29 = vmul.f32 0.0625, %v515_v27  ;;  %v518_v30 = vmul.f32 %v516_v28, %v516_v28  ;;  %v524_v37 = vsub.f32 %v718_v10, %v516_v28  ;;  %v525_v38 = vsub.f32 %v721_v12, %v516_v28 }
 0x230   :  { %v519_v31 = vsub.f32 %v517_v29, %v518_v30 }
 0x232   :  { %v520_v32 = vmax.f32 %v519_v31, 0.0 }
 0x234   :  { %v521_v33 = vadd.f32 1e-05, %v520_v32 }
 0x236   :  { %816 = vrsqrt.f32 %v521_v33 }
 0x243   :  { %v817_v35 = vpop.eup %816 }
 0x244   :  { %v523_v36 = vmul.f32 %v817_v35, %v498_v34 }
 0x246   :  { %v526_v43 = vmul.f32 %v524_v37, %v523_v36  ;;  %v527_v44 = vmul.f32 %v525_v38, %v523_v36 }
 0x248   :  { %v529_v45 = vadd.f32 %v527_v44, %v499_v42  ;;  %v528_v47 = vadd.f32 %v526_v43, %v499_v42 }
 0x24a   :  { %v530_v48 = vmax.f32 %v528_v47, 0.0  ;;  %v531_v49 = vmax.f32 %v529_v45, 0.0 }
 0x24c   :  { %v532_v50 = vpack.c.bf16 %v531_v49, %v530_v48 }
 0x24e   :  { %748 = vmatmul.mubr.bf16.vlgmr.msra.gmra.mxu0 %v532_v50 }
 0x30e   :  { %v632_v52 = vpop.f32.mrf.mxu0 }
 0x30f   :  { %v633_v53 = vadd.f32 %v632_v52, %v549_v51 }
 0x310   :  { %v749_v54 = vpop.f32.mrf.mxu0 }
 0x311   :  { %639 = vst [vmem:[#allocation11] sm:$0xff] %v633_v53 }
 0x312   :  { %v635_v55 = vpop.f32.mrf.mxu0 }
 0x313   :  { %v636_v56 = vadd.f32 %v635_v55, %v549_v51 }
 0x314   :  { %v750_v57 = vpop.f32.mrf.mxu0 }
 0x315   :  { %640 = vst [vmem:[#allocation11 + $0x8] sm:$0xff] %v636_v56 }
 0x316   :  { %909 = shalt.err (!%p906_p10)
}
 0x317   :  { %652 = dma.vmem_to_hbm [thread:$0]  %s647_s3, 256, %s1027_s4, [#allocation5], %s928_s20, %s928_s20, %s929_s21  }
 0x318   :  { %924 = dma.done.wait [#allocation5], 256  }
 0x319   :  { %925 = vsyncadd [#allocation5], 4294967040 }
 0x31a   :  { %656 = vsyncpa [#allocation4], 1 }
 0x31b   :  { %657 = vsyncpa [#allocation7], 1 }
 0x31c   :  { %658 = vsyncpa [#allocation10], 1 }
 0x31d   :  { %659 = vsyncpa [#allocation5], 1 }

</bundles_post_ra>
